<compile_context>
chip_gen: v5e
topology: v5e:2x2
jax: 0.10.0
libtpu: 0.0.40
codegen_flags: <defaults>
</compile_context>

<pallas_src>
import math
from functools import partial

import jax
import jax.numpy as jnp
from jax.experimental import pallas as pl
from jax.experimental.pallas import tpu as pltpu

_LANE = 128
_SUBLANE = 8
# Per-grid-step pipelined VMEM footprint budget (double-buffered z + out
# streams plus in-kernel f32 temporaries must fit here).  24 MiB keeps v7x
# (64 MiB physical VMEM/TC) comfortable and yields ~4-6 MiB z tiles.
_PIPELINE_VMEM_BUDGET = 24 * 1024 * 1024
# Explicit scoped-VMEM limit: above v5e's 16 MiB default, below v7x's 64 MiB
# physical ceiling, plenty of headroom over the 24 MiB pipeline budget.
_VMEM_LIMIT_BYTES = 40 * 1024 * 1024
_MIN_GRID_STEPS = 4


# ---------------------------------------------------------------------------
# Kernels
# ---------------------------------------------------------------------------
def _gen_add_kernel(z_ref, b_ref, o_ref):
    # o = z + bias  (bias is (1, P), sublane-broadcast over rows)
    o_ref[...] = z_ref[...] + b_ref[...]


def _gen_ell_scale_kernel(z_ref, xi_ref, b_ref, o_ref):
    # k == 1 (p is a multiple of 128): xi_ref is (TILE, 1) per-row scale,
    # lane-broadcast by the VPU/XLU.  No MXU needed.
    o_ref[...] = xi_ref[...] * z_ref[...] + b_ref[...]


def _gen_ell_mxu_kernel(z_ref, xi_ref, e_ref, b_ref, o_ref):
    # xi_ref: (TILE, k) compact per-original-row scale (k original rows folded
    #         into each lane-dense row of P = k*p lanes).
    # e_ref : (k, P) one-hot expansion matrix, E[g, g*p:(g+1)*p] = 1, so
    #         xi_wide[r, j] == xi of the original row that owns lane j.
    # Precision.HIGHEST keeps the expansion exact in f32 (xi is not truncated
    # to bf16); the MXU slot is idle in this HBM-bound kernel, so it is free.
    xi_wide = jnp.dot(xi_ref[...], e_ref[...],
                      preferred_element_type=jnp.float32,
                      precision=jax.lax.Precision.HIGHEST)
    o_ref[...] = xi_wide.astype(z_ref.dtype) * z_ref[...] + b_ref[...]


# ---------------------------------------------------------------------------
# Helpers
# ---------------------------------------------------------------------------
def _pick_tile_rows(n_rows, per_row_bytes):
    """Largest row tile whose full pipelined per-step VMEM footprint fits the
    budget, rounded to a multiple of 8 sublanes; keeps >= _MIN_GRID_STEPS grid
    steps when there is enough work for double-buffering / the v7x 2-TC split
    to overlap anything."""
    if n_rows <= _SUBLANE:
        return n_rows
    tile = _PIPELINE_VMEM_BUDGET // max(per_row_bytes, 1)
    if n_rows >= _MIN_GRID_STEPS * _SUBLANE and tile * _MIN_GRID_STEPS > n_rows:
        tile = -(-n_rows // _MIN_GRID_STEPS)          # cdiv
    tile = max(_SUBLANE, (tile // _SUBLANE) * _SUBLANE)
    return n_rows if tile >= n_rows else tile


def _per_row_xi(xi, z, dtype):
    """xi (scalar / (...,) / (..., 1), broadcastable to z's leading dims)
    -> per-row scale of shape (N, 1), N = prod(z.shape[:-1])."""
    xi = jnp.asarray(xi, dtype)
    lead = z.shape[:-1]
    if xi.ndim == z.ndim:
        if xi.shape[-1] != 1:
            raise ValueError(
                "xi must be a per-sample scale (trailing dim 1); got xi shape "
                f"{xi.shape} for z shape {z.shape}")
        xi = xi[..., 0]
    xi = jnp.broadcast_to(xi, lead)
    return xi.reshape(-1, 1)


# ---------------------------------------------------------------------------
# Wrapper ("Generator" forward)
# ---------------------------------------------------------------------------
@partial(jax.jit, static_argnames=("elliptical",))
def generator_forward(z, bias, xi=None, *, elliptical=False):
    """JAX/Pallas equivalent of Generator.forward.

    Args:
      z: array of shape (..., p).
      bias: array of shape (p,)  (the nn.Parameter; zeros at init).
      xi: optional per-sample scale, broadcastable to z's leading dims
          (scalar, (...,) or (..., 1)).
      elliptical: if True compute xi * z + bias, else z + bias.

    Returns:
      array of shape (N, p), N = prod(leading dims of z)  ( == x.view(-1, p) ).
    """
    if elliptical and xi is None:
        raise ValueError("elliptical=True requires xi")

    z_arr = jnp.asarray(z)
    p = int(bias.shape[0])
    z2 = z_arr.reshape(-1, p)
    n = z2.shape[0]
    dtype = z2.dtype
    itemsize = jnp.dtype(dtype).itemsize
    bias = bias.astype(dtype)

    # --- Unconditional lane-dense fold -------------------------------------
    # Pack k = 128 / gcd(p, 128) original rows per lane-dense row of
    # P = k*p lanes (a multiple of 128).  Pad <= k-1 dummy rows if needed and
    # slice them off the output after the call.
    k = _LANE // math.gcd(p, _LANE)
    pad = (-n) % k
    if pad:
        z2 = jnp.concatenate([z2, jnp.zeros((pad, p), dtype=dtype)], axis=0)
    n_tot = n + pad
    n_rows = n_tot // k
    P = k * p

    z_f = z2.reshape(n_rows, P)
    b_f = jnp.tile(bias, k).reshape(1, P)

    cparams = pltpu.CompilerParams(
        dimension_semantics=("parallel",),
        vmem_limit_bytes=_VMEM_LIMIT_BYTES)
    b_spec = pl.BlockSpec((1, P), lambda i: (0, 0))
    out_shape = jax.ShapeDtypeStruct((n_rows, P), dtype)

    if not elliptical:
        per_row_bytes = 4 * P * itemsize            # 2 dbuf x (z + out)
        tile = _pick_tile_rows(n_rows, per_row_bytes)
        zo_spec = pl.BlockSpec((tile, P), lambda i: (i, 0))
        cost = pl.CostEstimate(
            flops=n_rows * P, transcendentals=0,
            bytes_accessed=(2 * n_rows * P + P) * itemsize)
        out = pl.pallas_call(
            _gen_add_kernel,
            out_shape=out_shape,
            grid=(pl.cdiv(n_rows, tile),),
            in_specs=[zo_spec, b_spec],
            out_specs=zo_spec,
            compiler_params=cparams,
            cost_estimate=cost,
        )(z_f, b_f)
    else:
        xi_row = _per_row_xi(xi, z_arr, dtype)      # (n, 1)
        if pad:
            xi_row = jnp.concatenate(
                [xi_row, jnp.zeros((pad, 1), dtype=dtype)], axis=0)

        if k == 1:
            # p already a multiple of 128: per-row broadcast multiply, no MXU.
            xi_f = xi_row                           # (n_rows, 1)
            per_row_bytes = 4 * P * itemsize + 2 * itemsize + 4 * P
            tile = _pick_tile_rows(n_rows, per_row_bytes)
            zo_spec = pl.BlockSpec((tile, P), lambda i: (i, 0))
            xi_spec = pl.BlockSpec((tile, 1), lambda i: (i, 0))
            cost = pl.CostEstimate(
                flops=2 * n_rows * P, transcendentals=0,
                bytes_accessed=(2 * n_rows * P + n_rows + P) * itemsize)
            out = pl.pallas_call(
                _gen_ell_scale_kernel,
                out_shape=out_shape,
                grid=(pl.cdiv(n_rows, tile),),
                in_specs=[zo_spec, xi_spec, b_spec],
                out_specs=zo_spec,
                compiler_params=cparams,
                cost_estimate=cost,
            )(z_f, xi_f, b_f)
        else:
            # Compact (n_rows, k) xi; lane expansion done in-kernel on the MXU
            # (no 8-wide zero padding of xi -> no extra HBM traffic, no extra
            # materialization kernel).
            xi_f = xi_row.reshape(n_rows, k)
            expand = (jnp.arange(P, dtype=jnp.int32)[None, :] // p
                      == jnp.arange(k, dtype=jnp.int32)[:, None]).astype(dtype)
            per_row_bytes = (4 * P + 2 * k) * itemsize + 8 * P   # + f32 temps
            tile = _pick_tile_rows(n_rows, per_row_bytes)
            zo_spec = pl.BlockSpec((tile, P), lambda i: (i, 0))
            xi_spec = pl.BlockSpec((tile, k), lambda i: (i, 0))
            e_spec = pl.BlockSpec((k, P), lambda i: (0, 0))
            cost = pl.CostEstimate(
                flops=2 * n_rows * P * (k + 1), transcendentals=0,
                bytes_accessed=(2 * n_rows * P + n_rows * k + k * P + P) * itemsize)
            out = pl.pallas_call(
                _gen_ell_mxu_kernel,
                out_shape=out_shape,
                grid=(pl.cdiv(n_rows, tile),),
                in_specs=[zo_spec, xi_spec, e_spec, b_spec],
                out_specs=zo_spec,
                compiler_params=cparams,
                cost_estimate=cost,
            )(z_f, xi_f, expand, b_f)

    x = out.reshape(n_tot, p)
    if pad:
        x = x[:n]
    return x


# ---------------------------------------------------------------------------
# Main
# ---------------------------------------------------------------------------
if __name__ == "__main__":
    key = jax.random.PRNGKey(0)
    (k_z, k_xi, k_z3, k_xi3,
     k_z128, k_xi128, k_z48, k_xi48) = jax.random.split(key, 8)

    # --- p = 32: lane-dense fold (k = 4), no row padding --------------------
    p = 32
    batch = 8
    # nn.Parameter(torch.zeros(p)) at init; use a deterministic nonzero bias
    # so the add is observable.
    bias = jnp.arange(p, dtype=jnp.float32) * 0.01
    z = jax.random.normal(k_z, (batch, p), dtype=jnp.float32)
    xi = jax.random.uniform(k_xi, (batch, 1), dtype=jnp.float32) + 0.5

    out_plain = jax.block_until_ready(generator_forward(z, bias, elliptical=False))
    out_ell = jax.block_until_ready(
        generator_forward(z, bias, xi=xi, elliptical=True))
    assert out_plain.shape == (batch, p)
    assert jnp.allclose(out_plain, (z + bias).reshape(-1, p), atol=1e-6)
    assert out_ell.shape == (batch, p)
    assert jnp.allclose(out_ell, (xi * z + bias).reshape(-1, p), atol=1e-6)

    # --- p = 32, 3-D z with N % k != 0 (row pad + output slice) and xi that
    #     only broadcasts over z's leading dims (xi (3,1,1) vs z (3,2,32)) ---
    z3 = jax.random.normal(k_z3, (3, 2, p), dtype=jnp.float32)        # N = 6
    xi3 = jax.random.uniform(k_xi3, (3, 1, 1), dtype=jnp.float32) + 0.5
    out3p = jax.block_until_ready(generator_forward(z3, bias, elliptical=False))
    out3e = jax.block_until_ready(
        generator_forward(z3, bias, xi=xi3, elliptical=True))
    assert out3p.shape == (6, p)
    assert jnp.allclose(out3p, (z3 + bias).reshape(-1, p), atol=1e-6)
    assert out3e.shape == (6, p)
    assert jnp.allclose(out3e, (xi3 * z3 + bias).reshape(-1, p), atol=1e-6)

    # --- p = 128: k == 1 path (per-row scale kernel, no MXU expansion) ------
    p128 = 128
    bias128 = jnp.arange(p128, dtype=jnp.float32) * 0.01
    z128 = jax.random.normal(k_z128, (8, p128), dtype=jnp.float32)
    xi128 = jax.random.uniform(k_xi128, (8, 1), dtype=jnp.float32) + 0.5
    out128 = jax.block_until_ready(
        generator_forward(z128, bias128, xi=xi128, elliptical=True))
    assert out128.shape == (8, p128)
    assert jnp.allclose(out128, (xi128 * z128 + bias128).reshape(-1, p128),
                        atol=1e-6)

    # --- p = 48 (does not divide 128): generalized fold k = 8, P = 384 ------
    p48 = 48
    bias48 = jnp.arange(p48, dtype=jnp.float32) * 0.01
    z48 = jax.random.normal(k_z48, (5, p48), dtype=jnp.float32)       # N = 5
    xi48 = jax.random.uniform(k_xi48, (5, 1), dtype=jnp.float32) + 0.5
    out48 = jax.block_until_ready(
        generator_forward(z48, bias48, xi=xi48, elliptical=True))
    assert out48.shape == (5, p48)
    assert jnp.allclose(out48, (xi48 * z48 + bias48).reshape(-1, p48), atol=1e-6)

    print("KERNEL_OK")
</pallas_src>

<mosaic_0001>
module attributes {stable_mosaic.version = 11 : i64} {
  func.func @_gen_add_kernel(%arg0: i32, %arg1: memref<2x128xf32, #tpu.memory_space<vmem>>, %arg2: memref<1x128xf32, #tpu.memory_space<vmem>>, %arg3: memref<2x128xf32, #tpu.memory_space<vmem>>) attributes {dimension_semantics = [#tpu.dimension_semantics<parallel>], iteration_bounds = array<i64: 1>, scalar_prefetch = 0 : i64, scratch_operands = 0 : i64, tpu.core_type = #tpu.core_type<tc>, window_params = [{transform_indices = @transform_0, window_bounds = array<i64: 2, 128>}, {pipeline_mode = #tpu.pipeline_mode<synchronous>, transform_indices = @transform_1, window_bounds = array<i64: 1, 128>}, {transform_indices = @transform_2, window_bounds = array<i64: 2, 128>}]} {
    %c0 = arith.constant 0 : index
    %c0_0 = arith.constant 0 : index
    %0 = vector.load %arg1[%c0, %c0_0] : memref<2x128xf32, #tpu.memory_space<vmem>>, vector<2x128xf32>
    %c0_1 = arith.constant 0 : index
    %c0_2 = arith.constant 0 : index
    %1 = vector.load %arg2[%c0_1, %c0_2] : memref<1x128xf32, #tpu.memory_space<vmem>>, vector<1x128xf32>
    %2 = vector.broadcast %1 : vector<1x128xf32> to vector<2x128xf32>
    %3 = arith.addf %0, %2 : vector<2x128xf32>
    %c0_3 = arith.constant 0 : index
    %c0_4 = arith.constant 0 : index
    %4 = vector.load %arg3[%c0_3, %c0_4] : memref<2x128xf32, #tpu.memory_space<vmem>>, vector<2x128xf32>
    tpu.vector_store %arg3[%c0_3, %c0_4], %3 {strides = array<i32>} : memref<2x128xf32, #tpu.memory_space<vmem>>, vector<2x128xf32>,
    return
  }
  func.func @transform_0(%arg0: i32) -> (i32, i32) {
    %c0_i32 = arith.constant 0 : i32
    %c0_i32_0 = arith.constant 0 : i32
    return %arg0, %c0_i32 : i32, i32
  }
  func.func @transform_1(%arg0: i32) -> (i32, i32) {
    %c0_i32 = arith.constant 0 : i32
    %c0_i32_0 = arith.constant 0 : i32
    %c0_i32_1 = arith.constant 0 : i32
    return %c0_i32, %c0_i32_0 : i32, i32
  }
  func.func @transform_2(%arg0: i32) -> (i32, i32) {
    %c0_i32 = arith.constant 0 : i32
    %c0_i32_0 = arith.constant 0 : i32
    return %arg0, %c0_i32 : i32, i32
  }
}

</mosaic_0001>

<bundles_post_ra>
// kernel: tile.9
= control target key start
LH: loop header
LB: loop body
LE: loop exit
PB: predicated region body
PF: predicated region fallthrough
CT: control target
= control target key end

     0   :  { %s37_s8 = smov 32   ;;  %s38_s9 = smov 64   ;;  %vm7_vm0 = vcmask 261120   ;;  %vm13_vm1 = vcmask 1048320   ;;  %vm19_vm2 = vcmask 785920   ;;  %vm25_vm3 = vcmask 523520   ;;  %s55_s0 = inlined_call_operand.vmem [shape: f32[4,32], index: 0, kind: input, shape index: {}]   ;;  %s56_s1 = inlined_call_operand.vmem [shape: f32[1,128], index: 1, kind: output, shape index: {}]  }
   0x1   :  { %v4_v0 = vld [vmem:[%s55_s0] sm:$0xf]  ;;  %s36_s0 = smov 96  }
   0x2   :  { %5 = vst [vmem:[#allocation1] sm:$0xf] %v4_v0 }
   0x9   :  { %v10_v1 = vld [vmem:[#allocation1 + $0x3] sm:$0x1]   ;;  %v22_v2 = vld [vmem:[#allocation1 + $0x1] sm:$0x1]   ;;  %v16_v3 = vld [vmem:[#allocation1 + $0x2] sm:$0x1]  }
   0xa   :  { %11 = vrot.lane.b32.xlu0 %v10_v1, %s36_s0  ;;  %23 = vrot.lane.b32.xlu1 %v22_v2, %s37_s8  ;;  %v6_v4 = vld [vmem:[#allocation1] sm:$0x1]  }
   0xb   :  { %8 = vst.msk [vmem:[#allocation0] sm:$0x1] %vm7_vm0, %v6_v4  }
  0x12   :  { %17 = vrot.lane.b32.xlu0 %v16_v3, %s38_s9 }
  0x7c   :  { %v12_v5 = vpop.permute.xlu0 %11   ;;  %v24_v6 = vpop.permute.xlu1 %23  }
  0x7d   :  { %14 = vst.msk [vmem:[#allocation0] sm:$0x1] %vm13_vm1, %v12_v5  }
  0x84   :  { %v18_v7 = vpop.permute.xlu0 %17  }
  0x85   :  { %20 = vst.msk [vmem:[#allocation0] sm:$0x1] %vm19_vm2, %v18_v7  }
  0x86   :  { %26 = vst.msk [vmem:[#allocation0] sm:$0x1] %vm25_vm3, %v24_v6  }
  0x8d   :  { %v29_v8 = vld [vmem:[#allocation0] sm:$0x1] }
  0x8e   :  { %32 = vst [vmem:[%s56_s1] sm:$0x1] %v29_v8 }

// kernel: tile.8
= control target key start
LH: loop header
LB: loop body
LE: loop exit
PB: predicated region body
PF: predicated region fallthrough
CT: control target
= control target key end

     0   :  { %s22_s0 = inlined_call_operand.vmem [shape: f32[32], index: 0, kind: input, shape index: {}]   ;;  %s23_s1 = inlined_call_operand.vmem [shape: f32[4,32], index: 1, kind: output, shape index: {}]  }
   0x1   :  { %v4_v0 = vld [vmem:[%s22_s0] ss:$0 sm:$0xff] }
   0x2   :  { %5 = vst [vmem:[%s23_s1] sm:$0xf] %v4_v0 }

// kernel: generator_forward.1
= control target key start
LH: loop header
LB: loop body
LE: loop exit
PB: predicated region body
PF: predicated region fallthrough
CT: control target
= control target key end

     0   :  { %s47_s0 = inlined_call_operand.vmem [shape: f32[2,128], index: 0, kind: input, shape index: {}]   ;;  %s48_s1 = inlined_call_operand.vmem [shape: f32[1,128], index: 1, kind: input, shape index: {}]   ;;  %s49_s2 = inlined_call_operand.vmem [shape: f32[2,128], index: 2, kind: output, shape index: {}]  }
   0x1   :  { %v11_v0 = vld [vmem:[%s47_s0] sm:$0x3] }
   0x2   :  { %v22_v1 = vld [vmem:[%s48_s1] ss:$0 sm:$0xff] }
   0x3   :  { %v16_v2 = vadd.f32 %v22_v1, %v11_v0 }
   0x5   :  { %17 = vst [vmem:[%s49_s2] sm:$0x3] %v16_v2 }

</bundles_post_ra>
